<compile_context>
chip_gen: v7x
topology: tpu7x:2x2x1
jax: 0.10.0
libtpu: 0.0.40
codegen_flags: <defaults>
</compile_context>

<pallas_src>
import math
from functools import partial

import jax
import jax.numpy as jnp
from jax.experimental import pallas as pl
from jax.experimental.pallas import tpu as pltpu

LP_OCC_FEATURE_ID = 8
N_ATOM_TARGETS = 4
N_BOND_TARGETS = 7
N_LP_TARGETS = 5
N_LP_TARGETS_CE = 4
N_FEATURES = N_ATOM_TARGETS + N_LP_TARGETS + N_BOND_TARGETS  # 16

LANES = 8 * N_FEATURES          # 128 lanes = 8 node "slots" x 16 features
DEFAULT_TILE_ROWS = 2048        # rows of the [*, 128] view per grid step
                                # (16384 nodes, ~2.25 MiB/step streamed)


def _node_loss_kernel(yhat_ref, y_ref, m_ref, out_ref, *, tr, valid_rows):
    """One row tile of the lane-dense layout; lane l = 16*slot + feature."""
    step = pl.program_id(0)

    @pl.when(step == 0)
    def _init():
        out_ref[...] = jnp.zeros_like(out_ref)

    yhat = yhat_ref[...].astype(jnp.float32)          # [tr, 128]
    y = y_ref[...].astype(jnp.float32)                # [tr, 128]

    # Column pattern from a (1,128) iota; broadcasting expands it lazily in the
    # selects (cheap sublane broadcast, no full-tile int32 temporaries).
    lane = jax.lax.broadcasted_iota(jnp.int32, (1, LANES), 1)
    feat = lane % N_FEATURES
    ce_col = (feat >= N_ATOM_TARGETS) & (feat < N_ATOM_TARGETS + N_LP_TARGETS_CE)

    # Ragged-tile guard: rows at/after `valid_rows` hold unspecified data and
    # must never be selected (their y/y_hat/mask may be garbage, even inf/NaN).
    row_id = jax.lax.broadcasted_iota(jnp.int32, (tr, 1), 0) + step * tr
    row_valid = row_id < valid_rows                   # [tr, 1] bool

    node_mask = (m_ref[...] != 0) & row_valid         # [tr, 128] bool
    lp_ce = node_mask & ce_col                        # lp node on a CE lane

    # Segmented softmax over the 4 CE lanes (16k+4 .. 16k+7) of each group.
    # 3-roll log-step max tree (idempotent): coverage {l-3 .. l+3} regardless
    # of roll direction; non-CE lanes are -1e30 so groups never mix.
    neg_big = jnp.float32(-1e30)
    logits = jnp.where(ce_col, yhat, neg_big)
    t = jnp.maximum(logits, pltpu.roll(logits, shift=1, axis=1))
    t = jnp.maximum(t, pltpu.roll(t, shift=2, axis=1))
    seg_max = jnp.maximum(t, pltpu.roll(t, shift=LANES - 3, axis=1))

    exps = jnp.where(ce_col, jnp.exp(yhat - seg_max), 0.0)
    # 3-roll disjoint-window sum tree: the 8-lane window's extra lanes are
    # exactly zero and never reach another group's CE lanes.
    s = exps + pltpu.roll(exps, shift=1, axis=1)
    s = s + pltpu.roll(s, shift=2, axis=1)
    denom = s + pltpu.roll(s, shift=LANES - 4, axis=1)

    # Soft-target cross entropy (only lp nodes on CE lanes contribute).  Keep
    # the select form: unselected lanes may carry inf/NaN that must never be
    # multiplied by a 0/1 mask.
    log_sm = (yhat - seg_max) - jnp.log(denom)
    ce_lane = jnp.where(lp_ce, -(y * log_sm), 0.0)

    # Masked squared error; lp CE lanes compare against softmax(y_hat), which
    # mirrors log_mse_metric's in-place softmax substitution.  The divide only
    # feeds per-column metrics, so the approximate EUP reciprocal is fine.
    softm = exps * pl.reciprocal(jnp.where(ce_col, denom, 1.0), approx=True)
    yhat_mod = jnp.where(lp_ce, softm, yhat)
    diff = y - yhat_mod
    sq = jnp.where(node_mask, diff * diff, 0.0)
    cnt = node_mask.astype(jnp.float32)

    if tr % 8 == 0:
        # Log-depth tree of (8,128)-aligned vreg adds; folded 8->1 on the host.
        def tile_partial(x):
            parts = [x[8 * j:8 * (j + 1), :] for j in range(tr // 8)]
            while len(parts) > 1:
                nxt = [a + b for a, b in zip(parts[0::2], parts[1::2])]
                if len(parts) % 2:
                    nxt.append(parts[-1])
                parts = nxt
            return parts[0]

        out_ref[0:8, :] += tile_partial(sq)
        out_ref[8:16, :] += tile_partial(ce_lane)
        out_ref[16:24, :] += tile_partial(cnt)
    else:
        # Tiny single-block fallback (row count not a multiple of 8).
        out_ref[0:1, :] += jnp.sum(sq, axis=0, keepdims=True)
        out_ref[8:9, :] += jnp.sum(ce_lane, axis=0, keepdims=True)
        out_ref[16:17, :] += jnp.sum(cnt, axis=0, keepdims=True)


@partial(jax.jit, static_argnames=("tile_rows",))
def _node_loss_device(y_hat, y, is_atom, is_lp, is_bond, *,
                      tile_rows=DEFAULT_TILE_ROWS):
    n, f = y_hat.shape
    assert f == N_FEATURES

    # Stream f32/bf16 activations as-is (bf16 halves HBM traffic); anything
    # else is cast to f32.  All in-kernel math is f32.
    def as_stream(a):
        return a if a.dtype.name in ("float32", "bfloat16") else a.astype(jnp.float32)

    y_hat = as_stream(y_hat)
    y = as_stream(y)

    # Lane-dense view needs N % 8 == 0.  The common case is copy-free; a
    # non-multiple-of-8 batch pays a single small (<8 rows) pad copy.
    pad = (-n) % 8
    if pad:
        y_hat = jnp.pad(y_hat, ((0, pad), (0, 0)))
        y = jnp.pad(y, ((0, pad), (0, 0)))
        is_atom = jnp.pad(is_atom, (0, pad))
        is_lp = jnp.pad(is_lp, (0, pad))
        is_bond = jnp.pad(is_bond, (0, pad))
    rows = (n + pad) // 8

    # Combined int8 mask M[n,16]: cols 0..3 <- is_atom, 4..8 <- is_lp,
    # 9..15 <- is_bond.  Column sums of M give the per-type node counts.
    colr = jnp.arange(N_FEATURES, dtype=jnp.int32)
    atom_c = colr < N_ATOM_TARGETS
    lp_c = (colr >= N_ATOM_TARGETS) & (colr < N_ATOM_TARGETS + N_LP_TARGETS)
    bond_c = colr >= N_ATOM_TARGETS + N_LP_TARGETS
    mask = (((is_atom != 0)[:, None] & atom_c[None, :])
            | ((is_lp != 0)[:, None] & lp_c[None, :])
            | ((is_bond != 0)[:, None] & bond_c[None, :])).astype(jnp.int8)

    # Trivial (same flat order) reshapes -> no extra HBM pass.
    yh_ld = y_hat.reshape(rows, LANES)
    y_ld = y.reshape(rows, LANES)
    m_ld = mask.reshape(rows, LANES)

    if rows <= tile_rows:
        tr, k = rows, 1                       # single full-extent block
    else:
        assert tile_rows % 32 == 0, "tile_rows must be a multiple of 32"
        tr = tile_rows
        k = (rows + tile_rows - 1) // tile_rows   # ragged last tile, masked in-kernel

    block = pl.BlockSpec((tr, LANES), lambda i: (i, 0))
    out_spec = pl.BlockSpec((3 * 8, LANES), lambda i: (0, 0))   # resident accumulator

    in_row_bytes = LANES * (y_hat.dtype.itemsize + y.dtype.itemsize + 1)
    compiler_kwargs = dict(dimension_semantics=("arbitrary",))
    # Only raise the scoped-VMEM limit when large tiles actually need it.
    if 4 * tr * in_row_bytes > 12 * 1024 * 1024:
        compiler_kwargs["vmem_limit_bytes"] = min(8 * tr * in_row_bytes,
                                                  100 * 1024 * 1024)

    acc = pl.pallas_call(
        partial(_node_loss_kernel, tr=tr, valid_rows=rows),
        out_shape=jax.ShapeDtypeStruct((3 * 8, LANES), jnp.float32),
        grid_spec=pltpu.PrefetchScalarGridSpec(
            num_scalar_prefetch=0,
            grid=(k,),
            in_specs=[block, block, block],
            out_specs=out_spec),
        compiler_params=pltpu.CompilerParams(**compiler_kwargs),
        cost_estimate=pl.CostEstimate(
            flops=40 * rows * LANES,
            transcendentals=3 * rows * LANES,
            bytes_accessed=rows * in_row_bytes + 3 * 8 * LANES * 4),
    )(yh_ld, y_ld, m_ld)

    # Fold the (24,128) partials: 8 sublane rows per slab, 8 node slots per
    # feature -> (3, 16).
    fold = acc.reshape(3, 8, 8, N_FEATURES).sum(axis=(1, 2))
    col_sse, col_ce, col_cnt = fold[0], fold[1], fold[2]

    n_atom = col_cnt[0]
    n_lp = col_cnt[LP_OCC_FEATURE_ID]
    n_bond = col_cnt[N_ATOM_TARGETS + N_LP_TARGETS]

    sse_atom = jnp.sum(col_sse[:N_ATOM_TARGETS])
    sse_lp_occ = col_sse[LP_OCC_FEATURE_ID]
    sse_bond = jnp.sum(col_sse[N_ATOM_TARGETS + N_LP_TARGETS:])
    ce_sum = jnp.sum(col_ce)

    # NOTE: like the PyTorch reference, this yields inf/nan if a node type is
    # entirely absent from the batch.
    loss_atom = sse_atom / (n_atom * N_ATOM_TARGETS)
    loss_lp_clf = ce_sum / n_lp
    loss_lp_mse = sse_lp_occ / n_lp
    loss_orbital_mse = sse_bond / (n_bond * N_BOND_TARGETS)
    loss = loss_atom + loss_lp_clf + loss_lp_mse + loss_orbital_mse

    col_counts = jnp.where(atom_c, n_atom, jnp.where(lp_c, n_lp, n_bond))
    per_col = col_sse / col_counts

    metrics_vec = jnp.concatenate(
        [jnp.stack([loss_atom, loss_lp_clf, loss_lp_mse, loss_orbital_mse]),
         per_col])
    return loss, metrics_vec


_METRIC_NAMES = ('loss_atom', 'loss_lp_clf', 'loss_lp_mse', 'loss_orbital_mse')


def node_loss(y_hat, y, is_atom, is_lp, is_bond, *, tile_rows=DEFAULT_TILE_ROWS):
    loss, metrics_vec = _node_loss_device(y_hat, y, is_atom, is_lp, is_bond,
                                          tile_rows=tile_rows)
    mv = jax.device_get(metrics_vec)   # single host transfer for all metrics
    metrics = {name: float(mv[j]) for j, name in enumerate(_METRIC_NAMES)}
    for i in range(N_FEATURES):
        metrics[f'loss_node_{i}'] = float(mv[len(_METRIC_NAMES) + i])
    return loss, metrics


def _reference(y_hat, y, is_atom, is_lp, is_bond):
    """Pure-JAX mirror of the PyTorch forward (loss terms), for validation."""
    atom = is_atom == 1
    lp = is_lp == 1
    bond = is_bond == 1
    a_sl = slice(None, N_ATOM_TARGETS)
    ce_sl = slice(N_ATOM_TARGETS, N_ATOM_TARGETS + N_LP_TARGETS_CE)
    b_sl = slice(N_ATOM_TARGETS + N_LP_TARGETS, None)

    loss_atom = jnp.mean((y[atom][:, a_sl] - y_hat[atom][:, a_sl]) ** 2)
    logsm = jax.nn.log_softmax(y_hat[lp][:, ce_sl], axis=-1)
    loss_lp_clf = jnp.mean(-jnp.sum(y[lp][:, ce_sl] * logsm, axis=-1))
    loss_lp_mse = jnp.mean((y[lp][:, LP_OCC_FEATURE_ID]
                            - y_hat[lp][:, LP_OCC_FEATURE_ID]) ** 2)
    loss_orbital_mse = jnp.mean((y[bond][:, b_sl] - y_hat[bond][:, b_sl]) ** 2)
    return {
        'loss_atom': float(loss_atom),
        'loss_lp_clf': float(loss_lp_clf),
        'loss_lp_mse': float(loss_lp_mse),
        'loss_orbital_mse': float(loss_orbital_mse),
        'loss': float(loss_atom + loss_lp_clf + loss_lp_mse + loss_orbital_mse),
    }


def _check(n, counts, tile_rows, seed):
    assert sum(counts) == n
    key = jax.random.PRNGKey(seed)
    k1, k2 = jax.random.split(key)
    y_hat = jax.random.normal(k1, (n, N_FEATURES), dtype=jnp.float32)
    y = jax.random.normal(k2, (n, N_FEATURES), dtype=jnp.float32)

    node_type = jnp.concatenate([
        jnp.zeros(counts[0], jnp.int32),
        jnp.ones(counts[1], jnp.int32),
        jnp.full((counts[2],), 2, jnp.int32)])
    is_atom = (node_type == 0).astype(jnp.int32)
    is_lp = (node_type == 1).astype(jnp.int32)
    is_bond = (node_type == 2).astype(jnp.int32)

    loss, metrics = node_loss(y_hat, y, is_atom, is_lp, is_bond,
                              tile_rows=tile_rows)
    loss = float(jax.block_until_ready(loss))

    ref = _reference(y_hat, y, is_atom, is_lp, is_bond)
    for name in _METRIC_NAMES:
        assert abs(metrics[name] - ref[name]) <= 2e-4 * max(1.0, abs(ref[name])), \
            (name, metrics[name], ref[name])
    assert abs(loss - ref['loss']) <= 2e-4 * max(1.0, abs(ref['loss'])), \
        (loss, ref['loss'])
    assert all(math.isfinite(v) for v in metrics.values())
    return loss


if __name__ == "__main__":
    # 24 nodes (multiple of 8): single full-extent block, fully copy-free path.
    _check(n=24, counts=(10, 6, 8), tile_rows=DEFAULT_TILE_ROWS, seed=0)
    # 1000 nodes with a tiny 32-row tile: multi-step accumulation plus a ragged
    # (unspecified-data) last tile that must be masked in-kernel.
    _check(n=1000, counts=(400, 300, 300), tile_rows=32, seed=1)
    # 1003 nodes (not a multiple of 8): exercises the small pad fallback.
    _check(n=1003, counts=(400, 303, 300), tile_rows=DEFAULT_TILE_ROWS, seed=2)
    print("KERNEL_OK")
</pallas_src>

<mosaic_0001>
module attributes {stable_mosaic.version = 11 : i64} {
  func.func @_node_loss_kernel(%arg0: i32, %arg1: memref<3x128xf32, #tpu.memory_space<vmem>>, %arg2: memref<3x128xf32, #tpu.memory_space<vmem>>, %arg3: memref<3x128xi8, #tpu.memory_space<vmem>>, %arg4: memref<24x128xf32, #tpu.memory_space<vmem>>) attributes {dimension_semantics = [#tpu.dimension_semantics<arbitrary>], iteration_bounds = array<i64: 1>, scalar_prefetch = 0 : i64, scratch_operands = 0 : i64, tpu.core_type = #tpu.core_type<tc>, window_params = [{transform_indices = @transform_0, window_bounds = array<i64: 3, 128>}, {transform_indices = @transform_1, window_bounds = array<i64: 3, 128>}, {transform_indices = @transform_2, window_bounds = array<i64: 3, 128>}, {pipeline_mode = #tpu.pipeline_mode<synchronous>, transform_indices = @transform_3, window_bounds = array<i64: 24, 128>}]} {
    %c0_i32 = arith.constant 0 : i32
    %0 = arith.cmpi eq, %arg0, %c0_i32 : i32
    %1 = arith.extui %0 : i1 to i32
    %c0_i32_0 = arith.constant 0 : i32
    %2 = arith.cmpi ne, %1, %c0_i32_0 : i32
    scf.if %2 {
      %cst_32 = arith.constant 0.000000e+00 : f32
      %98 = vector.broadcast %cst_32 : f32 to vector<24x128xf32>
      %c0_33 = arith.constant 0 : index
      %c0_34 = arith.constant 0 : index
      %99 = vector.load %arg4[%c0_33, %c0_34] : memref<24x128xf32, #tpu.memory_space<vmem>>, vector<24x128xf32>
      tpu.vector_store %arg4[%c0_33, %c0_34], %98 {strides = array<i32>} : memref<24x128xf32, #tpu.memory_space<vmem>>, vector<24x128xf32>,
    } else {
    }
    %c0 = arith.constant 0 : index
    %c0_1 = arith.constant 0 : index
    %3 = vector.load %arg1[%c0, %c0_1] : memref<3x128xf32, #tpu.memory_space<vmem>>, vector<3x128xf32>
    %c0_2 = arith.constant 0 : index
    %c0_3 = arith.constant 0 : index
    %4 = vector.load %arg2[%c0_2, %c0_3] : memref<3x128xf32, #tpu.memory_space<vmem>>, vector<3x128xf32>
    %5 = tpu.iota {dimensions = array<i32: 1>} : vector<1x128xi32>
    %c16_i32 = arith.constant 16 : i32
    %c0_i32_4 = arith.constant 0 : i32
    %6 = arith.cmpi eq, %c16_i32, %c0_i32_4 : i32
    %c1_i32 = arith.constant 1 : i32
    %7 = arith.select %6, %c1_i32, %c16_i32 : i32
    %8 = vector.broadcast %7 : i32 to vector<1x128xi32>
    %9 = arith.remsi %5, %8 : vector<1x128xi32>
    %c0_i32_5 = arith.constant 0 : i32
    %10 = vector.broadcast %c0_i32_5 : i32 to vector<1x128xi32>
    %11 = arith.cmpi ne, %9, %10 : vector<1x128xi32>
    %c0_i32_6 = arith.constant 0 : i32
    %12 = vector.broadcast %c0_i32_6 : i32 to vector<1x128xi32>
    %13 = arith.cmpi slt, %9, %12 : vector<1x128xi32>
    %c0_i32_7 = arith.constant 0 : i32
    %14 = arith.cmpi slt, %7, %c0_i32_7 : i32
    %15 = vector.broadcast %14 : i1 to vector<1x128xi1>
    %16 = vector.broadcast %15 : vector<1x128xi1> to vector<1x128xi1>
    %17 = arith.xori %13, %16 : vector<1x128xi1>
    %18 = arith.andi %17, %11 : vector<1x128xi1>
    %19 = vector.broadcast %7 : i32 to vector<1x128xi32>
    %20 = arith.addi %9, %19 : vector<1x128xi32>
    %21 = arith.select %18, %20, %9 : vector<1x128xi1>, vector<1x128xi32>
    %c4_i32 = arith.constant 4 : i32
    %22 = vector.broadcast %c4_i32 : i32 to vector<1x128xi32>
    %23 = arith.cmpi sge, %21, %22 : vector<1x128xi32>
    %c8_i32 = arith.constant 8 : i32
    %24 = vector.broadcast %c8_i32 : i32 to vector<1x128xi32>
    %25 = arith.cmpi slt, %21, %24 : vector<1x128xi32>
    %26 = arith.andi %23, %25 : vector<1x128xi1>
    %27 = tpu.iota {dimensions = array<i32: 0>} : vector<3x1xi32>
    %c3_i32 = arith.constant 3 : i32
    %28 = arith.muli %arg0, %c3_i32 : i32
    %29 = vector.broadcast %28 : i32 to vector<3x1xi32>
    %30 = arith.addi %27, %29 : vector<3x1xi32>
    %c3_i32_8 = arith.constant 3 : i32
    %31 = vector.broadcast %c3_i32_8 : i32 to vector<3x1xi32>
    %32 = arith.cmpi slt, %30, %31 : vector<3x1xi32>
    %c0_9 = arith.constant 0 : index
    %c0_10 = arith.constant 0 : index
    %33 = vector.load %arg3[%c0_9, %c0_10] : memref<3x128xi8, #tpu.memory_space<vmem>>, vector<3x128xi8>
    %c0_i8 = arith.constant 0 : i8
    %34 = vector.broadcast %c0_i8 : i8 to vector<3x128xi8>
    %35 = arith.cmpi ne, %33, %34 : vector<3x128xi8>
    %36 = vector.broadcast %32 : vector<3x1xi1> to vector<3x128xi1>
    %37 = arith.andi %35, %36 : vector<3x128xi1>
    %38 = vector.broadcast %26 : vector<1x128xi1> to vector<3x128xi1>
    %39 = arith.andi %37, %38 : vector<3x128xi1>
    %cst = arith.constant -1.000000e+30 : f32
    %40 = vector.shape_cast %26 : vector<1x128xi1> to vector<1x128xi1>
    %41 = vector.broadcast %40 : vector<1x128xi1> to vector<3x128xi1>
    %42 = vector.broadcast %cst : f32 to vector<3x128xf32>
    %43 = arith.select %41, %3, %42 : vector<3x128xi1>, vector<3x128xf32>
    %c1_i32_11 = arith.constant 1 : i32
    %44 = tpu.dynamic_rotate %43 by %c1_i32_11 dim 1 : vector<3x128xf32>, i32 -> vector<3x128xf32>
    %45 = arith.maximumf %43, %44 : vector<3x128xf32>
    %c2_i32 = arith.constant 2 : i32
    %46 = tpu.dynamic_rotate %45 by %c2_i32 dim 1 : vector<3x128xf32>, i32 -> vector<3x128xf32>
    %47 = arith.maximumf %45, %46 : vector<3x128xf32>
    %c125_i32 = arith.constant 125 : i32
    %48 = tpu.dynamic_rotate %47 by %c125_i32 dim 1 : vector<3x128xf32>, i32 -> vector<3x128xf32>
    %49 = arith.maximumf %47, %48 : vector<3x128xf32>
    %50 = arith.subf %3, %49 : vector<3x128xf32>
    %51 = math.exp %50 : vector<3x128xf32>
    %cst_12 = arith.constant 0.000000e+00 : f32
    %52 = vector.shape_cast %26 : vector<1x128xi1> to vector<1x128xi1>
    %53 = vector.broadcast %52 : vector<1x128xi1> to vector<3x128xi1>
    %54 = vector.broadcast %cst_12 : f32 to vector<3x128xf32>
    %55 = arith.select %53, %51, %54 : vector<3x128xi1>, vector<3x128xf32>
    %c1_i32_13 = arith.constant 1 : i32
    %56 = tpu.dynamic_rotate %55 by %c1_i32_13 dim 1 : vector<3x128xf32>, i32 -> vector<3x128xf32>
    %57 = arith.addf %55, %56 : vector<3x128xf32>
    %c2_i32_14 = arith.constant 2 : i32
    %58 = tpu.dynamic_rotate %57 by %c2_i32_14 dim 1 : vector<3x128xf32>, i32 -> vector<3x128xf32>
    %59 = arith.addf %57, %58 : vector<3x128xf32>
    %c124_i32 = arith.constant 124 : i32
    %60 = tpu.dynamic_rotate %59 by %c124_i32 dim 1 : vector<3x128xf32>, i32 -> vector<3x128xf32>
    %61 = arith.addf %59, %60 : vector<3x128xf32>
    %62 = arith.subf %3, %49 : vector<3x128xf32>
    %63 = math.log %61 : vector<3x128xf32>
    %64 = arith.subf %62, %63 : vector<3x128xf32>
    %65 = arith.mulf %4, %64 : vector<3x128xf32>
    %cst_15 = arith.constant 0.000000e+00 : f32
    %66 = vector.broadcast %cst_15 : f32 to vector<3x128xf32>
    %67 = arith.subf %66, %65 : vector<3x128xf32>
    %cst_16 = arith.constant 0.000000e+00 : f32
    %68 = vector.broadcast %cst_16 : f32 to vector<3x128xf32>
    %69 = arith.select %39, %67, %68 : vector<3x128xi1>, vector<3x128xf32>
    %cst_17 = arith.constant 1.000000e+00 : f32
    %70 = vector.shape_cast %26 : vector<1x128xi1> to vector<1x128xi1>
    %71 = vector.broadcast %70 : vector<1x128xi1> to vector<3x128xi1>
    %72 = vector.broadcast %cst_17 : f32 to vector<3x128xf32>
    %73 = arith.select %71, %61, %72 : vector<3x128xi1>, vector<3x128xf32>
    %74 = tpu.reciprocal %73 {approx = true} : vector<3x128xf32> -> vector<3x128xf32>
    %75 = arith.mulf %55, %74 : vector<3x128xf32>
    %76 = arith.select %39, %75, %3 : vector<3x128xi1>, vector<3x128xf32>
    %77 = arith.subf %4, %76 : vector<3x128xf32>
    %78 = arith.mulf %77, %77 : vector<3x128xf32>
    %cst_18 = arith.constant 0.000000e+00 : f32
    %79 = vector.broadcast %cst_18 : f32 to vector<3x128xf32>
    %80 = arith.select %37, %78, %79 : vector<3x128xi1>, vector<3x128xf32>
    %81 = arith.extui %37 : vector<3x128xi1> to vector<3x128xi32>
    %82 = arith.sitofp %81 : vector<3x128xi32> to vector<3x128xf32>
    %c0_19 = arith.constant 0 : index
    %c0_20 = arith.constant 0 : index
    %83 = vector.load %arg4[%c0_19, %c0_20] : memref<24x128xf32, #tpu.memory_space<vmem>>, vector<1x128xf32>
    %cst_21 = arith.constant dense<0.000000e+00> : vector<128xf32>
    %84 = vector.multi_reduction <add>, %80, %cst_21 [0] : vector<3x128xf32> to vector<128xf32>
    %85 = vector.shape_cast %84 : vector<128xf32> to vector<1x128xf32>
    %86 = arith.addf %83, %85 : vector<1x128xf32>
    %c0_22 = arith.constant 0 : index
    %c0_23 = arith.constant 0 : index
    %87 = vector.load %arg4[%c0_22, %c0_23] : memref<24x128xf32, #tpu.memory_space<vmem>>, vector<1x128xf32>
    tpu.vector_store %arg4[%c0_22, %c0_23], %86 {strides = array<i32>} : memref<24x128xf32, #tpu.memory_space<vmem>>, vector<1x128xf32>,
    %c8 = arith.constant 8 : index
    %c0_24 = arith.constant 0 : index
    %88 = vector.load %arg4[%c8, %c0_24] : memref<24x128xf32, #tpu.memory_space<vmem>>, vector<1x128xf32>
    %cst_25 = arith.constant dense<0.000000e+00> : vector<128xf32>
    %89 = vector.multi_reduction <add>, %69, %cst_25 [0] : vector<3x128xf32> to vector<128xf32>
    %90 = vector.shape_cast %89 : vector<128xf32> to vector<1x128xf32>
    %91 = arith.addf %88, %90 : vector<1x128xf32>
    %c8_26 = arith.constant 8 : index
    %c0_27 = arith.constant 0 : index
    %92 = vector.load %arg4[%c8_26, %c0_27] : memref<24x128xf32, #tpu.memory_space<vmem>>, vector<1x128xf32>
    tpu.vector_store %arg4[%c8_26, %c0_27], %91 {strides = array<i32>} : memref<24x128xf32, #tpu.memory_space<vmem>>, vector<1x128xf32>,
    %c16 = arith.constant 16 : index
    %c0_28 = arith.constant 0 : index
    %93 = vector.load %arg4[%c16, %c0_28] : memref<24x128xf32, #tpu.memory_space<vmem>>, vector<1x128xf32>
    %cst_29 = arith.constant dense<0.000000e+00> : vector<128xf32>
    %94 = vector.multi_reduction <add>, %82, %cst_29 [0] : vector<3x128xf32> to vector<128xf32>
    %95 = vector.shape_cast %94 : vector<128xf32> to vector<1x128xf32>
    %96 = arith.addf %93, %95 : vector<1x128xf32>
    %c16_30 = arith.constant 16 : index
    %c0_31 = arith.constant 0 : index
    %97 = vector.load %arg4[%c16_30, %c0_31] : memref<24x128xf32, #tpu.memory_space<vmem>>, vector<1x128xf32>
    tpu.vector_store %arg4[%c16_30, %c0_31], %96 {strides = array<i32>} : memref<24x128xf32, #tpu.memory_space<vmem>>, vector<1x128xf32>,
    return
  }
  func.func @transform_0(%arg0: i32) -> (i32, i32) {
    %c0_i32 = arith.constant 0 : i32
    %c0_i32_0 = arith.constant 0 : i32
    return %arg0, %c0_i32 : i32, i32
  }
  func.func @transform_1(%arg0: i32) -> (i32, i32) {
    %c0_i32 = arith.constant 0 : i32
    %c0_i32_0 = arith.constant 0 : i32
    return %arg0, %c0_i32 : i32, i32
  }
  func.func @transform_2(%arg0: i32) -> (i32, i32) {
    %c0_i32 = arith.constant 0 : i32
    %c0_i32_0 = arith.constant 0 : i32
    return %arg0, %c0_i32 : i32, i32
  }
  func.func @transform_3(%arg0: i32) -> (i32, i32) {
    %c0_i32 = arith.constant 0 : i32
    %c0_i32_0 = arith.constant 0 : i32
    %c0_i32_1 = arith.constant 0 : i32
    return %c0_i32, %c0_i32_0 : i32, i32
  }
}

</mosaic_0001>

<bundles_post_ra>
// kernel: _node_loss_device.1
= control target key start
LH: loop header
LB: loop body
LE: loop exit
PB: predicated region body
PF: predicated region fallthrough
CT: control target
= control target key end

     0   :  { %v25_v0 = vlaneseq  ;;  %v156_v1 = vmov 0.0   ;;  %v157_v7 = vmov 0   ;;  %s160_s22 = smov 125   ;;  %vm109_vm10 = vcmask 1042432   ;;  %s161_s27 = smov 124   ;;  %s254_s3 = inlined_call_operand.vmem [shape: f32[24,128], index: 3, kind: output, shape index: {}]   ;;  %s255_s0 = inlined_call_operand.vmem [shape: f32[3,128], index: 0, kind: input, shape index: {}]   ;;  %s256_s2 = inlined_call_operand.vmem [shape: s8[3,128], index: 2, kind: input, shape index: {}]   ;;  %s257_s1 = inlined_call_operand.vmem [shape: f32[3,128], index: 1, kind: input, shape index: {}]  }
   0x1   :  { %20 = vst [vmem:[%s254_s3] sm:$0xff] %v156_v1  ;;  %21 = vst [vmem:[%s254_s3 + $0x8] sm:$0xff] %v156_v1  ;;  %v194_v5 = vld [vmem:[%s255_s0] sm:$0x7]  ;;  %s158_s0 = smov 1  }
   0x2   :  { %22 = vst [vmem:[%s254_s3 + $0x10] sm:$0xff] %v156_v1  ;;  %v26_v2 = vand.u32 127, %v25_v0  ;;  %v43_v3 = vshrl.u32 %v25_v0, 7  ;;  %v48_v6 = vld [vmem:[%s256_s2] sm:$0x1]  ;;  %s159_s2 = smov 2  }
   0x3   :  { %vm49_vm4 = vnez %v48_v6  ;;  %v24_v52 = vld [vmem:[%s257_s1] sm:$0x7] }
   0x4   :  { %v31_v4 = vand.u32 15, %v26_v2  ;;  %vm47_vm0 = vcmp.lt.s32.totalorder %v43_v3, 3 }
   0x5   :  { %v52_v8 = vsel %vm47_vm0, 1, %v157_v7 }
   0x6   :  { %vm39_vm1 = vcmp.ge.s32.totalorder %v31_v4, 4  ;;  %vm40_vm2 = vcmp.lt.s32.totalorder %v31_v4, 8  ;;  %v53_v9 = vpack.c.b16 %v52_v8, %v52_v8 }
   0x7   :  { %vm199_vm3 = vmand %vm39_vm1, %vm40_vm2 }
   0x8   :  { %v54_v11 = vpack.c.b8 %v53_v9, %v53_v9  ;;  %v59_v12 = vsel %vm199_vm3, 1, %v157_v7  ;;  %v64_v13 = vsel %vm199_vm3, %v194_v5, -1e+30  ;;  %v108_v10 = vld [vmem:[%s254_s3] sm:$0x1] }
   0x9   :  { %v60_v14 = vpack.c.b16 %v59_v12, %v59_v12  ;;  %65 = vrot.lane.b32.xlu0 %v64_v13, %s158_s0  ;;  %v129_v40 = vld [vmem:[%s254_s3 + $0x10] sm:$0x1] }
   0xa   :  { %vm55_vm5 = vnez %v54_v11  ;;  %v119_v11 = vld [vmem:[%s254_s3 + $0x8] sm:$0x1] }
   0xb   :  { %vm208_vm6 = vmand %vm49_vm4, %vm55_vm5  ;;  %v61_v16 = vpack.c.b8 %v60_v14, %v60_v14 }
   0xc   :  { %v102_v28 = vsel %vm208_vm6, 16843009, %v157_v7 }
   0xd   :  { %vm62_vm7 = vnez %v61_v16  ;;  %v103_v29 = vunpack.c.0.s8 %v102_v28 }
   0xe   :  { %vm63_vm8 = vmand %vm208_vm6, %vm62_vm7 }
   0xf   :  { %v92_v17 = vsel %vm63_vm8, 16843009, %v157_v7  ;;  %vm219_vm9 = vcmp.ne.s32.totalorder %v103_v29, 0 }
  0x10   :  { %v143_v31 = vsel %vm219_vm9, 1.0, %v156_v1  ;;  %v93_v48 = vunpack.c.0.s8 %v92_v17 }
  0x11   :  { %v130_v32 = vsel %vm109_vm10, %v143_v31, 0.0 }
  0x12   :  { %v131_v33 = vrot.slane %v130_v32, 4  ;;  %vm94_vm11 = vcmp.ne.s32.totalorder %v93_v48, 0 }
  0x14   :  { %v132_v34 = vadd.f32 %v131_v33, %v130_v32 }
  0x16   :  { %v133_v35 = vrot.slane %v132_v34, 2 }
  0x18   :  { %v134_v37 = vadd.f32 %v133_v35, %v132_v34 }
  0x1a   :  { %v135_v39 = vrot.slane %v134_v37, 1 }
  0x1c   :  { %v136_v41 = vadd.f32 %v135_v39, %v134_v37 }
  0x1e   :  { %v137_v42 = vadd.f32 %v136_v41, %v129_v40 }
  0x20   :  { %138 = vst [vmem:[%s254_s3 + $0x10] sm:$0x1] %v137_v42 }
  0x7b   :  { %v66_v18 = vpop.permute.xlu0 %65 }
  0x7c   :  { %v67_v19 = vmax.f32 %v64_v13, %v66_v18 }
  0x7e   :  { %68 = vrot.lane.b32.xlu0 %v67_v19, %s159_s2 }
  0xf0   :  { %v69_v20 = vpop.permute.xlu0 %68 }
  0xf1   :  { %v70_v21 = vmax.f32 %v67_v19, %v69_v20 }
  0xf3   :  { %71 = vrot.lane.b32.xlu1 %v70_v21, %s160_s22 }
 0x165   :  { %v72_v22 = vpop.permute.xlu1 %71 }
 0x166   :  { %v73_v23 = vmax.f32 %v70_v21, %v72_v22 }
 0x168   :  { %v74_v24 = vsub.f32 %v194_v5, %v73_v23 }
 0x16a   :  { %v75_v25 = vmul.f32 1.442695, %v74_v24 }
 0x16c   :  { %150 = vpow2.f32 %v75_v25 }
 0x176   :  { %v151_v26 = vpop.eup %150 }
 0x177   :  { %v77_v27 = vsel %vm199_vm3, %v151_v26, 0.0 }
 0x178   :  { %78 = vrot.lane.b32.xlu1 %v77_v27, %s158_s0 }
 0x1ea   :  { %v79_v36 = vpop.permute.xlu1 %78 }
 0x1eb   :  { %v80_v38 = vadd.f32 %v79_v36, %v77_v27 }
 0x1ed   :  { %81 = vrot.lane.b32.xlu0 %v80_v38, %s159_s2 }
 0x25f   :  { %v82_v43 = vpop.permute.xlu0 %81 }
 0x260   :  { %v83_v44 = vadd.f32 %v82_v43, %v80_v38 }
 0x262   :  { %84 = vrot.lane.b32.xlu1 %v83_v44, %s161_s27 }
 0x2d4   :  { %v85_v45 = vpop.permute.xlu1 %84 }
 0x2d5   :  { %v86_v46 = vadd.f32 %v85_v45, %v83_v44 }
 0x2d7   :  { %152 = vlog2.f32 %v86_v46  ;;  %v96_v47 = vsel %vm199_vm3, %v86_v46, 1.0 }
 0x2d8   :  { %154 = vrcp.f32 %v96_v47 }
 0x2e1   :  { %v153_v49 = vpop.eup %152 }
 0x2e2   :  { %v155_v50 = vpop.eup %154  ;;  %v88_v51 = vmul.f32 0.6931472, %v153_v49 }
 0x2e3   :  { %v98_v53 = vmul.f32 %v155_v50, %v77_v27 }
 0x2e4   :  { %v89_v54 = vsub.f32 %v74_v24, %v88_v51 }
 0x2e5   :  { %v99_v55 = vsel %vm94_vm11, %v98_v53, %v194_v5 }
 0x2e6   :  { %v90_v56 = vmul.f32 %v89_v54, %v24_v52  ;;  %v100_v57 = vsub.f32 %v24_v52, %v99_v55 }
 0x2e8   :  { %v91_v58 = vsub.f32 0.0, %v90_v56  ;;  %v101_v59 = vmul.f32 %v100_v57, %v100_v57 }
 0x2ea   :  { %v95_v60 = vsel %vm94_vm11, %v91_v58, 0.0  ;;  %v105_v61 = vsel %vm219_vm9, %v101_v59, 0.0 }
 0x2eb   :  { %v110_v62 = vsel %vm109_vm10, %v105_v61, 0.0  ;;  %v120_v63 = vsel %vm109_vm10, %v95_v60, 0.0 }
 0x2ec   :  { %v111_v0 = vrot.slane %v110_v62, 4  ;;  %v121_v1 = vrot.slane %v120_v63, 4 }
 0x2ee   :  { %v112_v2 = vadd.f32 %v111_v0, %v110_v62  ;;  %v122_v3 = vadd.f32 %v121_v1, %v120_v63 }
 0x2f0   :  { %v113_v4 = vrot.slane %v112_v2, 2  ;;  %v123_v6 = vrot.slane %v122_v3, 2 }
 0x2f2   :  { %v114_v7 = vadd.f32 %v113_v4, %v112_v2  ;;  %v124_v5 = vadd.f32 %v123_v6, %v122_v3 }
 0x2f4   :  { %v115_v8 = vrot.slane %v114_v7, 1  ;;  %v125_v9 = vrot.slane %v124_v5, 1 }
 0x2f6   :  { %v116_v12 = vadd.f32 %v115_v8, %v114_v7  ;;  %v126_v13 = vadd.f32 %v125_v9, %v124_v5 }
 0x2f8   :  { %v117_v14 = vadd.f32 %v116_v12, %v108_v10  ;;  %v127_v15 = vadd.f32 %v126_v13, %v119_v11 }
 0x2fa   :  { %118 = vst [vmem:[%s254_s3] sm:$0x1] %v117_v14  ;;  %128 = vst [vmem:[%s254_s3 + $0x8] sm:$0x1] %v127_v15 }

</bundles_post_ra>
